<compile_context>
chip_gen: v7x
topology: tpu7x:2x2x1
jax: 0.10.0
libtpu: 0.0.40
codegen_flags: <defaults>
</compile_context>

<pallas_src>
import functools

import jax
import jax.numpy as jnp
from jax import lax
from jax.experimental import pallas as pl
from jax.experimental.pallas import tpu as pltpu


def _onehot_dict_kernel(x_ref, dict_ref, o_ref):
    # x_ref   : (1, V, TP)  scores; vocab on sublanes, pixels on lanes
    # dict_ref: (E, V)      embedding table, pre-transposed (grid-constant)
    # o_ref   : (1, E, TP)  gathered embeddings, already channel-major
    x = x_ref[0]                                                  # (V, TP)
    v = x.shape[0]

    # argmax over the vocab (sublane) axis with first-occurrence tie-break
    # (matches torch.argmax for finite inputs; NaN handling differs).
    vocab_iota = lax.broadcasted_iota(jnp.int32, x.shape, 0)      # (V, TP)
    col_max = jnp.max(x, axis=0, keepdims=True)                   # (1, TP) VPU
    masked = jnp.where(x == col_max, vocab_iota, v)               # iota dies here
    argmax_idx = jnp.min(masked, axis=0, keepdims=True)           # (1, TP) VPU

    # One-hot built from `masked` (no extra pass over vocab_iota); cast to the
    # dict dtype so a bf16 dictionary feeds a single-pass bf16 MXU matmul.
    onehot = (masked == argmax_idx).astype(dict_ref.dtype)        # (V, TP)

    # Canonical (E,V)x(V,TP) -> (E,TP) MXU gather with f32 accumulation.
    # With an f32 dict the bf16 decomposition is exact for 0/1 one-hot rhs.
    out = jnp.dot(dict_ref[...], onehot,
                  preferred_element_type=jnp.float32)             # (E, TP)
    o_ref[0] = out.astype(o_ref.dtype)


def _vmem_capacity_bytes():
    """Per-core VMEM capacity (v5e/v6e: 128 MiB, v7x: 64 MiB); conservative
    fallback if the query is unavailable."""
    try:
        cap = getattr(pltpu.get_tpu_info(), "vmem_capacity_bytes", None)
        if cap:
            return int(cap)
    except Exception:
        pass
    return 64 << 20


def _working_set_bytes(tile_p, C, V, E, dict_itemsize):
    io = 2 * (C + E) * tile_p * 4          # double-buffered x / out tiles
    dict_bufs = 2 * V * E * dict_itemsize  # double-buffered dictionary
    temps = (3 * V + E) * tile_p * 4       # iota/masked/onehot + matmul result
    return io + dict_bufs + temps


def _pick_tile_p(P_pad, C, V, E, dict_itemsize, budget_bytes, prefer_multi_step):
    """Largest lane-dense (multiple-of-128) divisor of the padded pixel count
    whose full working set (IO double-buffers + dictionary buffers + in-kernel
    temporaries) fits the generation-aware VMEM budget."""
    cands = [d for d in range(128, P_pad + 1, 128) if P_pad % d == 0]
    if prefer_multi_step:                      # keep >= 2 pixel steps (megacore)
        multi = [d for d in cands if P_pad // d >= 2]
        if multi:
            cands = multi
    fitting = [d for d in cands
               if _working_set_bytes(d, C, V, E, dict_itemsize) <= budget_bytes]
    if fitting:
        return max(fitting)
    return min(cands)   # smallest lane-dense tile; let Mosaic try anyway


def conv_onehot_dictionary(x, dictionary, *, tile_p=None, mxu_bf16=False):
    """x: (B, C, G, G), dictionary: (V, E) with V == C.
    Returns (B, E, G, G) f32, matching ConvOneHotDictionary.forward."""
    B, C, G1, G2 = x.shape
    V, E = dictionary.shape
    assert V == C, "vocab_size must equal the channel dim of x"

    P = G1 * G2
    P_pad = -(-P // 128) * 128           # lane-dense pixel axis (unmasked vst)

    # Pure reshape (contiguous trailing dims) -- no HBM transpose of x.
    x_cm = x.reshape(B, C, P)
    if P_pad != P:
        # Padded pixels produce garbage embeddings that are sliced off below.
        x_cm = jnp.pad(x_cm, ((0, 0), (0, 0), (0, P_pad - P)))

    # One-time (V,E) -> (E,V) transpose in HBM keeps the MXU in its native
    # (M,K)x(K,N) orientation.  Optional bf16 cast halves dict DMA/VMEM and
    # gives a single-pass MXU gather (embeddings then bf16-rounded).
    dict_ev = dictionary.T
    dict_ev = dict_ev.astype(jnp.bfloat16 if mxu_bf16 else jnp.float32)
    d_item = dict_ev.dtype.itemsize

    capacity = _vmem_capacity_bytes()
    budget = int(capacity * 0.7)
    if tile_p is None:
        tile_p = _pick_tile_p(P_pad, C, V, E, d_item, budget,
                              prefer_multi_step=(B == 1))
    assert P_pad % tile_p == 0 and tile_p % 128 == 0, "tile_p must be a 128-multiple divisor"

    required = _working_set_bytes(tile_p, C, V, E, d_item)
    vmem_limit = min(capacity, max(32 << 20, required + (4 << 20)))

    cost = pl.CostEstimate(
        flops=2 * B * V * E * P_pad,
        transcendentals=0,
        bytes_accessed=B * (C + E) * P_pad * 4 + V * E * d_item)

    out_cm = pl.pallas_call(
        _onehot_dict_kernel,
        out_shape=jax.ShapeDtypeStruct((B, E, P_pad), jnp.float32),
        grid_spec=pltpu.PrefetchScalarGridSpec(
            num_scalar_prefetch=0,
            grid=(B, P_pad // tile_p),
            in_specs=[
                # Pixel-score tile: vocab (sublanes) x pixels (lanes).
                pl.BlockSpec((1, C, tile_p), lambda b, j: (b, 0, j)),
                # Full dictionary, constant index_map -> fetched once, reused.
                # TODO(synk): for very large V*E on v7x, single-buffer it via
                # pipeline_mode=pl.Buffered(1) to reclaim the duplicate buffer.
                pl.BlockSpec((E, V), lambda b, j: (0, 0)),
            ],
            out_specs=pl.BlockSpec((1, E, tile_p), lambda b, j: (b, 0, j)),
        ),
        compiler_params=pltpu.CompilerParams(
            dimension_semantics=("parallel", "parallel"),
            vmem_limit_bytes=int(vmem_limit)),
        cost_estimate=cost,
    )(x_cm, dict_ev)

    if P_pad != P:
        out_cm = out_cm[:, :, :P]
    # Pure reshape back -- output blocks are already in (B, E, G, G) layout.
    return out_cm.reshape(B, E, G1, G2)


def _reference(x, dictionary):
    tokens = jnp.argmax(jnp.transpose(x, (0, 2, 3, 1)), axis=-1)     # (B, G, G)
    embs = jnp.take(dictionary, tokens, axis=0)                      # (B, G, G, E)
    return jnp.transpose(embs, (0, 3, 1, 2))                         # (B, E, G, G)


if __name__ == "__main__":
    # Small shapes consistent with the module: vocab_size = C, emb_size = E.
    B, C, G = 2, 16, 16
    V, E = C, 128

    key = jax.random.PRNGKey(0)
    kx, kd = jax.random.split(key)
    x = jax.random.normal(kx, (B, C, G, G), dtype=jnp.float32)
    # nn.Embedding default init: N(0, 1)
    dictionary = jax.random.normal(kd, (V, E), dtype=jnp.float32)

    # Exact-gather (default, f32 dictionary) path.
    out = jax.block_until_ready(jax.jit(conv_onehot_dictionary)(x, dictionary))
    ref = _reference(x, dictionary)
    assert out.shape == (B, E, G, G), out.shape
    assert jnp.allclose(out, ref, atol=1e-6, rtol=1e-6), "mismatch (exact path)"

    # bf16-dictionary fast path (single-pass MXU): exact vs a bf16-rounded table.
    out_bf16 = jax.block_until_ready(
        jax.jit(functools.partial(conv_onehot_dictionary, mxu_bf16=True))(x, dictionary))
    ref_bf16 = _reference(x, dictionary.astype(jnp.bfloat16).astype(jnp.float32))
    assert jnp.allclose(out_bf16, ref_bf16, atol=1e-6, rtol=1e-6), "mismatch (bf16 path)"

    print("KERNEL_OK")
</pallas_src>

<mosaic_0001>
module attributes {stable_mosaic.version = 11 : i64} {
  func.func @_onehot_dict_kernel(%arg0: i32, %arg1: i32, %arg2: memref<1x16x256xf32, #tpu.memory_space<vmem>>, %arg3: memref<128x16xf32, #tpu.memory_space<vmem>>, %arg4: memref<1x128x256xf32, #tpu.memory_space<vmem>>) attributes {dimension_semantics = [#tpu.dimension_semantics<parallel>, #tpu.dimension_semantics<parallel>], iteration_bounds = array<i64: 2, 1>, scalar_prefetch = 0 : i64, scratch_operands = 0 : i64, tpu.core_type = #tpu.core_type<tc>, window_params = [{transform_indices = @transform_0, window_bounds = array<i64: 1, 16, 256>}, {pipeline_mode = #tpu.pipeline_mode<synchronous>, transform_indices = @transform_1, window_bounds = array<i64: 128, 16>}, {transform_indices = @transform_2, window_bounds = array<i64: 1, 128, 256>}]} {
    %c0 = arith.constant 0 : index
    %c0_0 = arith.constant 0 : index
    %c0_1 = arith.constant 0 : index
    %0 = vector.load %arg2[%c0, %c0_0, %c0_1] : memref<1x16x256xf32, #tpu.memory_space<vmem>>, vector<1x16x256xf32>
    %1 = vector.shape_cast %0 : vector<1x16x256xf32> to vector<16x256xf32>
    %2 = tpu.iota {dimensions = array<i32: 0>} : vector<16x256xi32>
    %cst = arith.constant dense<0xFF800000> : vector<256xf32>
    %3 = vector.multi_reduction <maximumf>, %1, %cst [0] : vector<16x256xf32> to vector<256xf32>
    %4 = vector.shape_cast %3 : vector<256xf32> to vector<1x256xf32>
    %5 = vector.broadcast %4 : vector<1x256xf32> to vector<16x256xf32>
    %6 = arith.cmpf oeq, %1, %5 : vector<16x256xf32>
    %c16_i32 = arith.constant 16 : i32
    %7 = vector.broadcast %c16_i32 : i32 to vector<16x256xi32>
    %8 = arith.select %6, %2, %7 : vector<16x256xi1>, vector<16x256xi32>
    %cst_2 = arith.constant dense<2147483647> : vector<256xi32>
    %9 = vector.multi_reduction <minsi>, %8, %cst_2 [0] : vector<16x256xi32> to vector<256xi32>
    %10 = vector.shape_cast %9 : vector<256xi32> to vector<1x256xi32>
    %11 = vector.broadcast %10 : vector<1x256xi32> to vector<16x256xi32>
    %12 = arith.cmpi eq, %8, %11 : vector<16x256xi32>
    %13 = arith.extui %12 : vector<16x256xi1> to vector<16x256xi32>
    %14 = arith.sitofp %13 : vector<16x256xi32> to vector<16x256xf32>
    %c0_3 = arith.constant 0 : index
    %c0_4 = arith.constant 0 : index
    %15 = vector.load %arg3[%c0_3, %c0_4] : memref<128x16xf32, #tpu.memory_space<vmem>>, vector<128x16xf32>
    %cst_5 = arith.constant dense<0.000000e+00> : vector<128x256xf32>
    %16 = tpu.matmul %15, %14, %cst_5 {dimension_numbers = #tpu.dot_dimension_numbers<[1], [0], [0], [1], [0, 0, 1, 1], [], []>} : vector<128x16xf32>, vector<16x256xf32>, vector<128x256xf32> -> vector<128x256xf32>
    %c0_6 = arith.constant 0 : index
    %c0_7 = arith.constant 0 : index
    %c0_8 = arith.constant 0 : index
    %17 = vector.load %arg4[%c0_6, %c0_7, %c0_8] : memref<1x128x256xf32, #tpu.memory_space<vmem>>, vector<1x128x256xf32>
    %18 = vector.shape_cast %17 : vector<1x128x256xf32> to vector<128x256xf32>
    %19 = vector.shape_cast %16 : vector<128x256xf32> to vector<1x128x256xf32>
    tpu.vector_store %arg4[%c0_6, %c0_7, %c0_8], %19 {strides = array<i32>} : memref<1x128x256xf32, #tpu.memory_space<vmem>>, vector<1x128x256xf32>,
    return
  }
  func.func @transform_0(%arg0: i32, %arg1: i32) -> (i32, i32, i32) {
    %c0_i32 = arith.constant 0 : i32
    %c0_i32_0 = arith.constant 0 : i32
    return %arg0, %c0_i32, %arg1 : i32, i32, i32
  }
  func.func @transform_1(%arg0: i32, %arg1: i32) -> (i32, i32) {
    %c0_i32 = arith.constant 0 : i32
    %c0_i32_0 = arith.constant 0 : i32
    %c0_i32_1 = arith.constant 0 : i32
    return %c0_i32, %c0_i32_0 : i32, i32
  }
  func.func @transform_2(%arg0: i32, %arg1: i32) -> (i32, i32, i32) {
    %c0_i32 = arith.constant 0 : i32
    %c0_i32_0 = arith.constant 0 : i32
    return %arg0, %c0_i32, %arg1 : i32, i32, i32
  }
}

</mosaic_0001>

<bundles_post_ra>
// kernel: conv_onehot_dictionary.1
= control target key start
LH: loop header
LB: loop body
LE: loop exit
PB: predicated region body
PF: predicated region fallthrough
CT: control target
= control target key end

     0   :  { %s701_s9 = smov 0   ;;  %s703_s10 = smov 0   ;;  %s852_s0 = inlined_call_operand.vmem [shape: f32[2,16,256], index: 0, kind: input, shape index: {}]   ;;  %s853_s1 = inlined_call_operand.vmem [shape: f32[128,16], index: 1, kind: input, shape index: {}]   ;;  %s854_s2 = inlined_call_operand.vmem [shape: f32[2,128,256], index: 2, kind: output, shape index: {}]  }
   0x1   :  { %s705_s11 = smov 0  }
   0x2 LB: > { %s24_s12 = sadd.s32 1, %s678_s10  ;;  %p595_p0 = scmp.ge.s32.totalorder %s682_s11, 1  ;;  %s682_s11 = sphi %s705_s11, %s12_s11   ;;  %s678_s10 = sphi %s703_s10, %s856_s10   ;;  %s674_s9 = sphi %s701_s9, %s855_s9  }
   0x3   : > { %p26_p1 = scmp.ge.s32.totalorder %s24_s12, 2  ;;  %p133_p2 = scmp.lt.s32.totalorder %s682_s11, 3 }
   0x5   : > { %s858_s12 = smov (%p26_p1, %s24_s12), 0  ;;  %p134_p3 = pnand %p595_p0, %p133_p2 }
   0x6   : > { %p164_p4 = scmp.lt.s32.totalorder (!%p134_p3), %s674_s9, 1  ;;  %v684_v0 = vmov (!%p134_p3), 0.0   ;;  %v187_v8 = vlaneseq (!%p134_p3)  ;;  %v685_v40 = vmov (!%p134_p3), 1.0|1.0   ;;  %v246_v41 = vld [vmem:[%s853_s1] sm:$0xff] (!%p134_p3)  ;;  %v247_v43 = vld [vmem:[%s853_s1 + $0x8] sm:$0xff] (!%p134_p3) }
   0x7   : > { %137 = sbr.rel (%p134_p3) target bundleno = 296 (0x128), region = 28  ;;  %375 = vmatprep.mubr.f32.mxu0 (!%p134_p3), %v684_v0  ;;  %423 = vmatprep.mubr.f32.mxu1 (!%p134_p3), %v684_v0  ;;  %v254_v42 = vld [vmem:[%s853_s1 + $0x40] sm:$0xff] (!%p134_p3)  ;;  %v255_v44 = vld [vmem:[%s853_s1 + $0x48] sm:$0xff] (!%p134_p3)  ;;  %v248_v45 = vld [vmem:[%s853_s1 + $0x10] sm:$0xff] (!%p134_p3) }
   0x8   : > { %v188_v13 = vshrl.u32 (!%p134_p3), %v187_v8, 7  ;;  %v256_v46 = vld [vmem:[%s853_s1 + $0x50] sm:$0xff] (!%p134_p3)  ;;  %v249_v47 = vld [vmem:[%s853_s1 + $0x18] sm:$0xff] (!%p134_p3)  ;;  %v250_v49 = vld [vmem:[%s853_s1 + $0x20] sm:$0xff] (!%p134_p3) }
   0x9   : > { %v257_v48 = vld [vmem:[%s853_s1 + $0x58] sm:$0xff] (!%p134_p3)  ;;  %v258_v50 = vld [vmem:[%s853_s1 + $0x60] sm:$0xff] (!%p134_p3)  ;;  %v251_v51 = vld [vmem:[%s853_s1 + $0x28] sm:$0xff] (!%p134_p3) }
   0xa   : > { %v189_v18 = vadd.s32 (!%p134_p3), 8, %v188_v13  ;;  %v259_v52 = vld [vmem:[%s853_s1 + $0x68] sm:$0xff] (!%p134_p3)  ;;  %v252_v53 = vld [vmem:[%s853_s1 + $0x30] sm:$0xff] (!%p134_p3)  ;;  %v253_v55 = vld [vmem:[%s853_s1 + $0x38] sm:$0xff] (!%p134_p3) }
   0xb   : > { %v260_v54 = vld [vmem:[%s853_s1 + $0x70] sm:$0xff] (!%p134_p3)  ;;  %v261_v56 = vld [vmem:[%s853_s1 + $0x78] sm:$0xff] (!%p134_p3) }
   0xe   : > { %s860_s9 = smov (!%p164_p4, %s674_s9), 1 }
   0xf   : > { %s626_s13 = sshll.u32 %s860_s9, 5  ;;  %s627_s25 = sshll.u32 %s860_s9, 8 }
  0x10   : > { %s171_s16 = scalar_lea.vmem %s852_s0, %s626_s13  ;;  %s809_s28 = scalar_lea.vmem %s854_s2, %s627_s25 }
  0x11   : > { %v184_v1 = vld [vmem:[%s171_s16 + $0x8] sm:$0xff]  ;;  %v186_v2 = vld [vmem:[%s171_s16 + $0x18] sm:$0xff]  ;;  %v183_v3 = vld [vmem:[%s171_s16] sm:$0xff] }
  0x12   : > { %v197_v4 = vmax.f32 %v184_v1, %v186_v2  ;;  %v185_v5 = vld [vmem:[%s171_s16 + $0x10] sm:$0xff] }
  0x13   : > { %v190_v6 = vmax.f32 %v183_v3, %v185_v5 }
  0x14   : > { %v198_v7 = vrot.slane %v197_v4, 4 }
  0x15   : > { %v191_v9 = vrot.slane %v190_v6, 4 }
  0x16   : > { %v199_v10 = vmax.f32 %v197_v4, %v198_v7 }
  0x17   : > { %v192_v11 = vmax.f32 %v190_v6, %v191_v9 }
  0x18   : > { %v200_v12 = vrot.slane %v199_v10, 2 }
  0x19   : > { %v193_v14 = vrot.slane %v192_v11, 2 }
  0x1a   : > { %v201_v15 = vmax.f32 %v199_v10, %v200_v12 }
  0x1b   : > { %v194_v16 = vmax.f32 %v192_v11, %v193_v14 }
  0x1c   : > { %v202_v17 = vrot.slane %v201_v15, 1 }
  0x1d   : > { %v195_v19 = vrot.slane %v194_v16, 1 }
  0x1e   : > { %v203_v20 = vmax.f32 %v201_v15, %v202_v17 }
  0x1f   : > { %v196_v21 = vmax.f32 %v194_v16, %v195_v19 }
  0x20   : > { %vm205_vm0 = vcmp.eq.f32.partialorder %v184_v1, %v203_v20  ;;  %vm207_vm1 = vcmp.eq.f32.partialorder %v186_v2, %v203_v20 }
  0x21   : > { %v209_v22 = vsel %vm205_vm0, %v188_v13, 16  ;;  %v211_v23 = vsel %vm207_vm1, %v189_v18, 16  ;;  %vm204_vm2 = vcmp.eq.f32.partialorder %v183_v3, %v196_v21  ;;  %vm206_vm3 = vcmp.eq.f32.partialorder %v185_v5, %v196_v21 }
  0x22   : > { %vm223_vm4 = vcmp.lt.s32.totalorder %v209_v22, %v211_v23  ;;  %v208_v24 = vsel %vm204_vm2, %v188_v13, 16  ;;  %v210_v25 = vsel %vm206_vm3, %v189_v18, 16  ;;  %vm262_vm2 = vcmask 130048  }
  0x23   : > { %v224_v26 = vsel %vm223_vm4, %v209_v22, %v211_v23  ;;  %vm212_vm5 = vcmp.lt.s32.totalorder %v208_v24, %v210_v25 }
  0x24   : > { %v225_v27 = vrot.slane %v224_v26, 4  ;;  %v213_v28 = vsel %vm212_vm5, %v208_v24, %v210_v25 }
  0x25   : > { %v214_v29 = vrot.slane %v213_v28, 4 }
  0x26   : > { %vm226_vm6 = vcmp.lt.s32.totalorder %v224_v26, %v225_v27 }
  0x27   : > { %v227_v30 = vsel %vm226_vm6, %v224_v26, %v225_v27  ;;  %vm215_vm7 = vcmp.lt.s32.totalorder %v213_v28, %v214_v29 }
  0x28   : > { %v228_v31 = vrot.slane %v227_v30, 2  ;;  %v216_v32 = vsel %vm215_vm7, %v213_v28, %v214_v29 }
  0x29   : > { %v217_v33 = vrot.slane %v216_v32, 2 }
  0x2a   : > { %vm229_vm8 = vcmp.lt.s32.totalorder %v227_v30, %v228_v31 }
  0x2b   : > { %v230_v34 = vsel %vm229_vm8, %v227_v30, %v228_v31  ;;  %vm218_vm9 = vcmp.lt.s32.totalorder %v216_v32, %v217_v33 }
  0x2c   : > { %v231_v35 = vrot.slane %v230_v34, 1  ;;  %v219_v36 = vsel %vm218_vm9, %v216_v32, %v217_v33 }
  0x2d   : > { %v220_v37 = vrot.slane %v219_v36, 1 }
  0x2e   : > { %vm232_vm10 = vcmp.lt.s32.totalorder %v230_v34, %v231_v35 }
  0x2f   : > { %v233_v38 = vsel %vm232_vm10, %v230_v34, %v231_v35  ;;  %vm221_vm11 = vcmp.lt.s32.totalorder %v219_v36, %v220_v37 }
  0x30   : > { %vm235_vm12 = vcmp.eq.s32.totalorder %v209_v22, %v233_v38  ;;  %vm237_vm13 = vcmp.eq.s32.totalorder %v211_v23, %v233_v38  ;;  %v222_v39 = vsel %vm221_vm11, %v219_v36, %v220_v37 }
  0x31   : > { %vm628_vm14 = vmpackc.low %vm237_vm13, %vm235_vm12  ;;  %vm234_vm15 = vcmp.eq.s32.totalorder %v208_v24, %v222_v39  ;;  %vm236_vm0 = vcmp.eq.s32.totalorder %v210_v25, %v222_v39 }
  0x32   : > { %629 = vmatprep.subr.msk.bf16.mxu0 %vm628_vm14, %v685_v40  ;;  %632 = vmatprep.subr.msk.bf16.mxu1 %vm628_vm14, %v685_v40  ;;  %vm630_vm1 = vmpackc.low %vm236_vm0, %vm234_vm15 }
  0x33   : > { %631 = vmatpush1.bf16.msk.msra.mxu0 %vm630_vm1, %v685_v40  ;;  %633 = vmatpush1.bf16.msk.msra.mxu1 %vm630_vm1, %v685_v40 }
  0x36   : > { %608 = vmatmul.mubr.msk.f32.vlgmr.msra.gmra.mrb[0].mxu0 %vm262_vm2, %v246_v41  ;;  %616 = vmatmul.mubr.msk.f32.vlgmr.msra.gmra.mrb[0].mxu1 %vm262_vm2, %v254_v42 }
  0x37   : > { %381 = vmatprep.mubr.f32.mxu0 %v684_v0  ;;  %429 = vmatprep.mubr.f32.mxu1 %v684_v0 }
  0x3a   : > { %609 = vmatmul.mubr.msk.f32.gmra.mrb[2].mxu0 %vm262_vm2, %v247_v43  ;;  %617 = vmatmul.mubr.msk.f32.gmra.mrb[2].mxu1 %vm262_vm2, %v255_v44 }
  0x3b   : > { %387 = vmatprep.mubr.f32.mxu0 %v684_v0  ;;  %435 = vmatprep.mubr.f32.mxu1 %v684_v0 }
  0x3e   : > { %610 = vmatmul.mubr.msk.f32.gmra.mrb[4].mxu0 %vm262_vm2, %v248_v45  ;;  %618 = vmatmul.mubr.msk.f32.gmra.mrb[4].mxu1 %vm262_vm2, %v256_v46 }
  0x3f   : > { %393 = vmatprep.mubr.f32.mxu0 %v684_v0  ;;  %441 = vmatprep.mubr.f32.mxu1 %v684_v0 }
  0x42   : > { %611 = vmatmul.mubr.msk.f32.gmra.mrb[6].mxu0 %vm262_vm2, %v249_v47  ;;  %619 = vmatmul.mubr.msk.f32.gmra.mrb[6].mxu1 %vm262_vm2, %v257_v48 }
  0x43   : > { %399 = vmatprep.mubr.f32.mxu0 %v684_v0  ;;  %447 = vmatprep.mubr.f32.mxu1 %v684_v0 }
  0x46   : > { %612 = vmatmul.mubr.msk.f32.gmra.mrb[8].mxu0 %vm262_vm2, %v250_v49  ;;  %620 = vmatmul.mubr.msk.f32.gmra.mrb[8].mxu1 %vm262_vm2, %v258_v50 }
  0x47   : > { %405 = vmatprep.mubr.f32.mxu0 %v684_v0  ;;  %453 = vmatprep.mubr.f32.mxu1 %v684_v0 }
  0x4a   : > { %613 = vmatmul.mubr.msk.f32.gmra.mrb[10].mxu0 %vm262_vm2, %v251_v51  ;;  %621 = vmatmul.mubr.msk.f32.gmra.mrb[10].mxu1 %vm262_vm2, %v259_v52 }
  0x4b   : > { %411 = vmatprep.mubr.f32.mxu0 %v684_v0  ;;  %459 = vmatprep.mubr.f32.mxu1 %v684_v0 }
  0x4e   : > { %614 = vmatmul.mubr.msk.f32.gmra.mrb[12].mxu0 %vm262_vm2, %v252_v53  ;;  %622 = vmatmul.mubr.msk.f32.gmra.mrb[12].mxu1 %vm262_vm2, %v260_v54 }
  0x4f   : > { %417 = vmatprep.mubr.f32.mxu0 %v684_v0  ;;  %465 = vmatprep.mubr.f32.mxu1 %v684_v0 }
  0x52   : > { %615 = vmatmul.mubr.msk.f32.gmra.mrb[14].mxu0 %vm262_vm2, %v253_v55  ;;  %623 = vmatmul.mubr.msk.f32.gmra.mrb[14].mxu1 %vm262_vm2, %v261_v56 }
 0x109   : > { %v377_v57 = vpop.f32.mrb[0].mxu0  ;;  %v425_v58 = vpop.f32.mrb[0].mxu1 }
 0x10a   : > { %472 = vst [vmem:[%s809_s28] sm:$0xff] %v377_v57  ;;  %488 = vst [vmem:[%s809_s28 + $0x80] sm:$0xff] %v425_v58  ;;  %v379_v59 = vpop.f32.mrb[1].mxu0  ;;  %v427_v60 = vpop.f32.mrb[1].mxu1 }
 0x10b   : > { %473 = vst [vmem:[%s809_s28 + $0x8] sm:$0xff] %v379_v59  ;;  %489 = vst [vmem:[%s809_s28 + $0x88] sm:$0xff] %v427_v60 }
 0x10d   : > { %v383_v61 = vpop.f32.mrb[2].mxu0  ;;  %v431_v62 = vpop.f32.mrb[2].mxu1 }
 0x10e   : > { %474 = vst [vmem:[%s809_s28 + $0x10] sm:$0xff] %v383_v61  ;;  %490 = vst [vmem:[%s809_s28 + $0x90] sm:$0xff] %v431_v62  ;;  %v385_v63 = vpop.f32.mrb[3].mxu0  ;;  %v433_v0 = vpop.f32.mrb[3].mxu1 }
 0x10f   : > { %475 = vst [vmem:[%s809_s28 + $0x18] sm:$0xff] %v385_v63  ;;  %491 = vst [vmem:[%s809_s28 + $0x98] sm:$0xff] %v433_v0 }
 0x111   : > { %v389_v1 = vpop.f32.mrb[4].mxu0  ;;  %v437_v2 = vpop.f32.mrb[4].mxu1 }
 0x112   : > { %476 = vst [vmem:[%s809_s28 + $0x20] sm:$0xff] %v389_v1  ;;  %492 = vst [vmem:[%s809_s28 + $0xa0] sm:$0xff] %v437_v2  ;;  %v391_v3 = vpop.f32.mrb[5].mxu0  ;;  %v439_v4 = vpop.f32.mrb[5].mxu1 }
 0x113   : > { %477 = vst [vmem:[%s809_s28 + $0x28] sm:$0xff] %v391_v3  ;;  %493 = vst [vmem:[%s809_s28 + $0xa8] sm:$0xff] %v439_v4 }
 0x115   : > { %v395_v5 = vpop.f32.mrb[6].mxu0  ;;  %v443_v6 = vpop.f32.mrb[6].mxu1 }
 0x116   : > { %478 = vst [vmem:[%s809_s28 + $0x30] sm:$0xff] %v395_v5  ;;  %494 = vst [vmem:[%s809_s28 + $0xb0] sm:$0xff] %v443_v6  ;;  %v397_v7 = vpop.f32.mrb[7].mxu0  ;;  %v445_v8 = vpop.f32.mrb[7].mxu1 }
 0x117   : > { %479 = vst [vmem:[%s809_s28 + $0x38] sm:$0xff] %v397_v7  ;;  %495 = vst [vmem:[%s809_s28 + $0xb8] sm:$0xff] %v445_v8 }
 0x119   : > { %v401_v9 = vpop.f32.mrb[8].mxu0  ;;  %v449_v10 = vpop.f32.mrb[8].mxu1 }
 0x11a   : > { %480 = vst [vmem:[%s809_s28 + $0x40] sm:$0xff] %v401_v9  ;;  %496 = vst [vmem:[%s809_s28 + $0xc0] sm:$0xff] %v449_v10  ;;  %v403_v11 = vpop.f32.mrb[9].mxu0  ;;  %v451_v12 = vpop.f32.mrb[9].mxu1 }
 0x11b   : > { %481 = vst [vmem:[%s809_s28 + $0x48] sm:$0xff] %v403_v11  ;;  %497 = vst [vmem:[%s809_s28 + $0xc8] sm:$0xff] %v451_v12 }
 0x11d   : > { %v407_v13 = vpop.f32.mrb[10].mxu0  ;;  %v455_v14 = vpop.f32.mrb[10].mxu1 }
 0x11e   : > { %482 = vst [vmem:[%s809_s28 + $0x50] sm:$0xff] %v407_v13  ;;  %498 = vst [vmem:[%s809_s28 + $0xd0] sm:$0xff] %v455_v14  ;;  %v409_v15 = vpop.f32.mrb[11].mxu0  ;;  %v457_v16 = vpop.f32.mrb[11].mxu1 }
 0x11f   : > { %483 = vst [vmem:[%s809_s28 + $0x58] sm:$0xff] %v409_v15  ;;  %499 = vst [vmem:[%s809_s28 + $0xd8] sm:$0xff] %v457_v16 }
 0x121   : > { %v413_v17 = vpop.f32.mrb[12].mxu0  ;;  %v461_v18 = vpop.f32.mrb[12].mxu1 }
 0x122   : > { %484 = vst [vmem:[%s809_s28 + $0x60] sm:$0xff] %v413_v17  ;;  %500 = vst [vmem:[%s809_s28 + $0xe0] sm:$0xff] %v461_v18  ;;  %v415_v19 = vpop.f32.mrb[13].mxu0  ;;  %v463_v20 = vpop.f32.mrb[13].mxu1 }
 0x123   : > { %485 = vst [vmem:[%s809_s28 + $0x68] sm:$0xff] %v415_v19  ;;  %501 = vst [vmem:[%s809_s28 + $0xe8] sm:$0xff] %v463_v20 }
 0x125   : > { %v419_v21 = vpop.f32.mrb[14].mxu0  ;;  %v467_v22 = vpop.f32.mrb[14].mxu1 }
 0x126   : > { %486 = vst [vmem:[%s809_s28 + $0x70] sm:$0xff] %v419_v21  ;;  %502 = vst [vmem:[%s809_s28 + $0xf0] sm:$0xff] %v467_v22  ;;  %v421_v23 = vpop.f32.mrb[15].mxu0  ;;  %v469_v24 = vpop.f32.mrb[15].mxu1 }
 0x127   : > { %487 = vst [vmem:[%s809_s28 + $0x78] sm:$0xff] %v421_v23  ;;  %503 = vst [vmem:[%s809_s28 + $0xf8] sm:$0xff] %v469_v24 }
 0x128 PF: > { %s12_s11 = sadd.s32 1, %s682_s11   ;;  %s855_s9 = smov %s678_s10 }
 0x129   : > { %p9_p5 = scmp.ge.s32.totalorder %s12_s11, 4   ;;  %s856_s10 = smov %s858_s12 }
 0x12b   :  { %11 = sbr.rel (!%p9_p5) target bundleno = 2 (0x2), region = 58 }

</bundles_post_ra>
